<compile_context>
chip_gen: v6e
topology: v6e:2x2x1
jax: 0.10.0
libtpu: 0.0.40
codegen_flags: <defaults>
</compile_context>

<pallas_src>
import math

import jax
import jax.numpy as jnp
import numpy as np
from jax import lax
from jax.experimental import pallas as pl
from jax.experimental.pallas import tpu as pltpu

# ----------------------------- config (small) -----------------------------
B = 2          # batch
T = 8          # sequence length (== cfg.block_size)
C = 32         # n_embd
H = 4          # n_head
HD = C // H    # head dim
R = 16         # LoRA rank
LORA_SCALE = 1.0 / R   # loralib default: lora_alpha=1 -> scaling = alpha/r
LN_EPS = 1e-5
NEG_BIG = -1e30


def _layernorm(x, g, b):
    # x: (T, C), g/b: (1, C)
    mu = jnp.mean(x, axis=-1, keepdims=True)
    var = jnp.mean((x - mu) ** 2, axis=-1, keepdims=True)
    return (x - mu) * jax.lax.rsqrt(var + LN_EPS) * g + b


def _gelu_tanh(x):
    # GELU(approximate='tanh')
    return 0.5 * x * (1.0 + jnp.tanh(0.7978845608028654 * (x + 0.044715 * x * x * x)))


# ------------------------------- the kernel -------------------------------
# vec_ref rows: 0 ln1_g, 1 ln1_b, 2 ln2_g, 3 ln2_b, 4 bq, 5 bk, 6 bv,
#               7 b_attn_proj, 8 b_proj2
# w4_ref slabs: 0 wq_t, 1 wk_t, 2 wv_t, 3 wproj_t   (all (in, out))
def block_kernel(x_ref, vec_ref, w4_ref, wfc_ref, bfc_ref, wp2_ref,
                 out_ref, att_ref):
    x = x_ref[0]                                            # (T, C) f32

    ln1g = vec_ref[0:1, :]
    ln1b = vec_ref[1:2, :]
    ln2g = vec_ref[2:3, :]
    ln2b = vec_ref[3:4, :]
    bq = vec_ref[4:5, :]
    bk = vec_ref[5:6, :]
    bv = vec_ref[6:7, :]
    bproj = vec_ref[7:8, :]
    bp2 = vec_ref[8:9, :]

    # ---- ln_1 + attention ----
    h1 = _layernorm(x, ln1g, ln1b)                          # (T, C)
    q = jnp.dot(h1, w4_ref[0], preferred_element_type=jnp.float32) + bq
    k = jnp.dot(h1, w4_ref[1], preferred_element_type=jnp.float32) + bk
    v = jnp.dot(h1, w4_ref[2], preferred_element_type=jnp.float32) + bv

    # causal additive bias built in-kernel (no extra DMA)
    row = lax.broadcasted_iota(jnp.int32, (T, T), 0)
    col = lax.broadcasted_iota(jnp.int32, (T, T), 1)
    bias = jnp.where(row >= col, 0.0, NEG_BIG).astype(jnp.float32)

    kt = k.T                                                # single XLU transpose per batch
    scale = 1.0 / math.sqrt(HD)

    scores = []
    head_outs = []
    for h in range(H):                                      # static unroll (H=4)
        c0 = h * HD
        qh = q[:, c0:c0 + HD]                               # (T, HD)
        kth = kt[c0:c0 + HD, :]                             # (HD, T) sublane-aligned slice
        vh = v[:, c0:c0 + HD]                               # (T, HD)

        s = jnp.dot(qh, kth, preferred_element_type=jnp.float32) * scale   # (T, T)
        scores.append(s)                                    # pre-mask scores (module output)

        masked = s + bias
        m = jnp.max(masked, axis=-1, keepdims=True)
        p = jnp.exp(masked - m)
        p = p / jnp.sum(p, axis=-1, keepdims=True)          # exact divide (correctness)
        head_outs.append(jnp.dot(p, vh, preferred_element_type=jnp.float32))   # (T, HD)

    att_slab = jnp.concatenate(scores, axis=-1)             # (T, H*T) lane-dense
    y = jnp.concatenate(head_outs, axis=-1)                 # (T, C), no VMEM round-trip

    attn_out = jnp.dot(y, w4_ref[3], preferred_element_type=jnp.float32) + bproj
    x1 = x + attn_out                                       # residual 1

    # ---- ln_2 + MLP (LoRA pre-merged into wfc / wp2 in the wrapper) ----
    h2 = _layernorm(x1, ln2g, ln2b)
    fc = jnp.dot(h2, wfc_ref[...],
                 preferred_element_type=jnp.float32) + bfc_ref[...]        # (T, 4C)
    act = _gelu_tanh(fc)
    mlp_out = jnp.dot(act, wp2_ref[...], preferred_element_type=jnp.float32) + bp2

    out_ref[0] = (x1 + mlp_out).astype(out_ref.dtype)       # one store per batch
    att_ref[0] = att_slab.astype(att_ref.dtype)             # one store per batch


# ------------------------------- wrapper -----------------------------------
def block_forward(x, params):
    # --- host-side parameter prep (outside the kernel) ---
    # Pre-merge LoRA:  y = xW^T + b + scale*(xA^T)B^T == x(W + scale*B@A)^T + b
    w_fc_eff = params["w_fc"] + LORA_SCALE * (params["blora_fc"] @ params["a_fc"])
    w_p2_eff = params["w_proj2"] + LORA_SCALE * (params["blora_proj2"] @ params["a_proj2"])

    # Split qkv and pre-transpose everything to (in, out); stack the 4 (C,C)
    # weights into one input array.
    wq_t = params["w_qkv"][0 * C:1 * C, :].T
    wk_t = params["w_qkv"][1 * C:2 * C, :].T
    wv_t = params["w_qkv"][2 * C:3 * C, :].T
    wproj_t = params["w_attn_proj"].T
    w4 = jnp.stack([wq_t, wk_t, wv_t, wproj_t], axis=0)     # (4, C, C)

    wfc_t = w_fc_eff.T                                       # (C, 4C)
    wp2_t = w_p2_eff.T                                       # (4C, C)
    bfc = params["b_fc"]                                     # (1, 4C)

    bq = params["b_qkv"][:, 0 * C:1 * C]
    bk = params["b_qkv"][:, 1 * C:2 * C]
    bv = params["b_qkv"][:, 2 * C:3 * C]
    vecs = jnp.concatenate(
        [params["ln1_g"], params["ln1_b"], params["ln2_g"], params["ln2_b"],
         bq, bk, bv, params["b_attn_proj"], params["b_proj2"]], axis=0)     # (9, C)

    inputs = [x, vecs, w4, wfc_t, bfc, wp2_t]

    in_specs = [
        pl.BlockSpec((1, T, C), lambda b: (b, 0, 0)),        # per-batch tokens
        pl.BlockSpec((9, C), lambda b: (0, 0)),              # packed LN/bias vectors
        pl.BlockSpec((4, C, C), lambda b: (0, 0, 0)),        # stacked attn weights
        pl.BlockSpec((C, 4 * C), lambda b: (0, 0)),
        pl.BlockSpec((1, 4 * C), lambda b: (0, 0)),
        pl.BlockSpec((4 * C, C), lambda b: (0, 0)),
    ]
    out_shapes = (
        jax.ShapeDtypeStruct((B, T, C), jnp.float32),        # output tokens
        jax.ShapeDtypeStruct((B, T, H * T), jnp.float32),    # lane-dense att slab
    )
    out_specs = (
        pl.BlockSpec((1, T, C), lambda b: (b, 0, 0)),
        pl.BlockSpec((1, T, H * T), lambda b: (b, 0, 0)),
    )

    fn = pl.pallas_call(
        block_kernel,
        out_shape=out_shapes,
        grid_spec=pltpu.PrefetchScalarGridSpec(
            num_scalar_prefetch=0,
            grid=(B,),                                       # one batch per step
            in_specs=in_specs,
            out_specs=out_specs,
        ),
        compiler_params=pltpu.CompilerParams(
            dimension_semantics=("parallel",),               # megacore on v7x
        ),
    )
    out, att = fn(*inputs)

    # att[b, t, h*T + s] == att1[b, h, t, s]
    att1 = att.reshape(B, T, H, T).transpose(0, 2, 1, 3)
    return out, att1


# --------------------------- pure-JAX reference -----------------------------
def block_reference(x, p):
    def ln(v, g, b):
        mu = v.mean(-1, keepdims=True)
        var = ((v - mu) ** 2).mean(-1, keepdims=True)
        return (v - mu) / jnp.sqrt(var + LN_EPS) * g + b

    h1 = ln(x, p["ln1_g"], p["ln1_b"])
    qkv = h1 @ p["w_qkv"].T + p["b_qkv"]
    q, k, v = jnp.split(qkv, 3, axis=-1)
    q = q.reshape(B, T, H, HD).transpose(0, 2, 1, 3)
    k = k.reshape(B, T, H, HD).transpose(0, 2, 1, 3)
    v = v.reshape(B, T, H, HD).transpose(0, 2, 1, 3)
    att1 = jnp.einsum("bhtd,bhsd->bhts", q, k) / math.sqrt(HD)
    mask = jnp.tril(jnp.ones((T, T), bool))
    att = jnp.where(mask, att1, -jnp.inf)
    att = jax.nn.softmax(att, axis=-1)
    y = jnp.einsum("bhts,bhsd->bhtd", att, v).transpose(0, 2, 1, 3).reshape(B, T, C)
    attn_out = y @ p["w_attn_proj"].T + p["b_attn_proj"]
    x1 = x + attn_out

    h2 = ln(x1, p["ln2_g"], p["ln2_b"])
    fc = h2 @ p["w_fc"].T + p["b_fc"] + LORA_SCALE * (h2 @ p["a_fc"].T) @ p["blora_fc"].T
    act = 0.5 * fc * (1 + jnp.tanh(0.7978845608028654 * (fc + 0.044715 * fc ** 3)))
    proj = (act @ p["w_proj2"].T + p["b_proj2"]
            + LORA_SCALE * (act @ p["a_proj2"].T) @ p["blora_proj2"].T)
    return x1 + proj, att1


# ------------------------------- main ---------------------------------------
if __name__ == "__main__":
    key = jax.random.PRNGKey(0)
    keys = jax.random.split(key, 16)

    def nrm(k, shape, scale=0.05):
        return jax.random.normal(k, shape, dtype=jnp.float32) * scale

    params = {
        "ln1_g": jnp.ones((1, C), jnp.float32),
        "ln1_b": jnp.zeros((1, C), jnp.float32),
        "ln2_g": jnp.ones((1, C), jnp.float32),
        "ln2_b": jnp.zeros((1, C), jnp.float32),
        "w_qkv": nrm(keys[0], (3 * C, C)),
        "b_qkv": nrm(keys[1], (1, 3 * C)),
        "w_attn_proj": nrm(keys[2], (C, C)),
        "b_attn_proj": nrm(keys[3], (1, C)),
        "w_fc": nrm(keys[4], (4 * C, C)),
        "b_fc": nrm(keys[5], (1, 4 * C)),
        "a_fc": nrm(keys[6], (R, C)),
        "blora_fc": nrm(keys[7], (4 * C, R)),   # loralib inits lora_B to 0; nonzero to exercise path
        "w_proj2": nrm(keys[8], (C, 4 * C)),
        "b_proj2": nrm(keys[9], (1, C)),
        "a_proj2": nrm(keys[10], (R, 4 * C)),
        "blora_proj2": nrm(keys[11], (C, R)),
    }

    x = jax.random.normal(keys[12], (B, T, C), dtype=jnp.float32)

    out, att1 = block_forward(x, params)
    out = jax.block_until_ready(out)
    att1 = jax.block_until_ready(att1)

    ref_out, ref_att1 = block_reference(x, params)
    np.testing.assert_allclose(np.asarray(out), np.asarray(ref_out), rtol=1e-4, atol=1e-4)
    np.testing.assert_allclose(np.asarray(att1), np.asarray(ref_att1), rtol=1e-4, atol=1e-4)

    print("KERNEL_OK")
</pallas_src>

<mosaic_0001>
module attributes {stable_mosaic.version = 11 : i64} {
  func.func @block_kernel(%arg0: i32, %arg1: memref<1x8x32xf32, #tpu.memory_space<vmem>>, %arg2: memref<9x32xf32, #tpu.memory_space<vmem>>, %arg3: memref<4x32x32xf32, #tpu.memory_space<vmem>>, %arg4: memref<32x128xf32, #tpu.memory_space<vmem>>, %arg5: memref<1x128xf32, #tpu.memory_space<vmem>>, %arg6: memref<128x32xf32, #tpu.memory_space<vmem>>, %arg7: memref<1x8x32xf32, #tpu.memory_space<vmem>>, %arg8: memref<1x8x32xf32, #tpu.memory_space<vmem>>) attributes {dimension_semantics = [#tpu.dimension_semantics<parallel>], iteration_bounds = array<i64: 2>, scalar_prefetch = 0 : i64, scratch_operands = 0 : i64, tpu.core_type = #tpu.core_type<tc>, window_params = [{transform_indices = @transform_0, window_bounds = array<i64: 1, 8, 32>}, {pipeline_mode = #tpu.pipeline_mode<synchronous>, transform_indices = @transform_1, window_bounds = array<i64: 9, 32>}, {pipeline_mode = #tpu.pipeline_mode<synchronous>, transform_indices = @transform_2, window_bounds = array<i64: 4, 32, 32>}, {pipeline_mode = #tpu.pipeline_mode<synchronous>, transform_indices = @transform_3, window_bounds = array<i64: 32, 128>}, {pipeline_mode = #tpu.pipeline_mode<synchronous>, transform_indices = @transform_4, window_bounds = array<i64: 1, 128>}, {pipeline_mode = #tpu.pipeline_mode<synchronous>, transform_indices = @transform_5, window_bounds = array<i64: 128, 32>}, {transform_indices = @transform_6, window_bounds = array<i64: 1, 8, 32>}, {transform_indices = @transform_7, window_bounds = array<i64: 1, 8, 32>}]} {
    %c0 = arith.constant 0 : index
    %c0_0 = arith.constant 0 : index
    %c0_1 = arith.constant 0 : index
    %0 = vector.load %arg1[%c0, %c0_0, %c0_1] : memref<1x8x32xf32, #tpu.memory_space<vmem>>, vector<1x8x32xf32>
    %1 = vector.shape_cast %0 : vector<1x8x32xf32> to vector<8x32xf32>
    %c0_2 = arith.constant 0 : index
    %c0_3 = arith.constant 0 : index
    %2 = vector.load %arg2[%c0_2, %c0_3] : memref<9x32xf32, #tpu.memory_space<vmem>>, vector<1x32xf32>
    %c1 = arith.constant 1 : index
    %c0_4 = arith.constant 0 : index
    %3 = vector.load %arg2[%c1, %c0_4] : memref<9x32xf32, #tpu.memory_space<vmem>>, vector<1x32xf32>
    %c2 = arith.constant 2 : index
    %c0_5 = arith.constant 0 : index
    %4 = vector.load %arg2[%c2, %c0_5] : memref<9x32xf32, #tpu.memory_space<vmem>>, vector<1x32xf32>
    %c3 = arith.constant 3 : index
    %c0_6 = arith.constant 0 : index
    %5 = vector.load %arg2[%c3, %c0_6] : memref<9x32xf32, #tpu.memory_space<vmem>>, vector<1x32xf32>
    %c4 = arith.constant 4 : index
    %c0_7 = arith.constant 0 : index
    %6 = vector.load %arg2[%c4, %c0_7] : memref<9x32xf32, #tpu.memory_space<vmem>>, vector<1x32xf32>
    %c5 = arith.constant 5 : index
    %c0_8 = arith.constant 0 : index
    %7 = vector.load %arg2[%c5, %c0_8] : memref<9x32xf32, #tpu.memory_space<vmem>>, vector<1x32xf32>
    %c6 = arith.constant 6 : index
    %c0_9 = arith.constant 0 : index
    %8 = vector.load %arg2[%c6, %c0_9] : memref<9x32xf32, #tpu.memory_space<vmem>>, vector<1x32xf32>
    %c7 = arith.constant 7 : index
    %c0_10 = arith.constant 0 : index
    %9 = vector.load %arg2[%c7, %c0_10] : memref<9x32xf32, #tpu.memory_space<vmem>>, vector<1x32xf32>
    %c8 = arith.constant 8 : index
    %c0_11 = arith.constant 0 : index
    %10 = vector.load %arg2[%c8, %c0_11] : memref<9x32xf32, #tpu.memory_space<vmem>>, vector<1x32xf32>
    %cst = arith.constant dense<0.000000e+00> : vector<8xf32>
    %11 = vector.multi_reduction <add>, %1, %cst [1] : vector<8x32xf32> to vector<8xf32>
    %12 = vector.shape_cast %11 : vector<8xf32> to vector<8x1xf32>
    %cst_12 = arith.constant 3.200000e+01 : f32
    %13 = vector.broadcast %cst_12 : f32 to vector<8x1xf32>
    %14 = arith.divf %12, %13 : vector<8x1xf32>
    %15 = vector.broadcast %14 : vector<8x1xf32> to vector<8x32xf32>
    %16 = arith.subf %1, %15 : vector<8x32xf32>
    %17 = arith.mulf %16, %16 : vector<8x32xf32>
    %cst_13 = arith.constant dense<0.000000e+00> : vector<8xf32>
    %18 = vector.multi_reduction <add>, %17, %cst_13 [1] : vector<8x32xf32> to vector<8xf32>
    %19 = vector.shape_cast %18 : vector<8xf32> to vector<8x1xf32>
    %cst_14 = arith.constant 3.200000e+01 : f32
    %20 = vector.broadcast %cst_14 : f32 to vector<8x1xf32>
    %21 = arith.divf %19, %20 : vector<8x1xf32>
    %22 = vector.broadcast %14 : vector<8x1xf32> to vector<8x32xf32>
    %23 = arith.subf %1, %22 : vector<8x32xf32>
    %cst_15 = arith.constant 9.99999974E-6 : f32
    %24 = vector.broadcast %cst_15 : f32 to vector<8x1xf32>
    %25 = arith.addf %21, %24 : vector<8x1xf32>
    %26 = math.rsqrt %25 : vector<8x1xf32>
    %27 = vector.broadcast %26 : vector<8x1xf32> to vector<8x32xf32>
    %28 = arith.mulf %23, %27 : vector<8x32xf32>
    %29 = vector.broadcast %2 : vector<1x32xf32> to vector<8x32xf32>
    %30 = arith.mulf %28, %29 : vector<8x32xf32>
    %31 = vector.broadcast %3 : vector<1x32xf32> to vector<8x32xf32>
    %32 = arith.addf %30, %31 : vector<8x32xf32>
    %c0_16 = arith.constant 0 : index
    %c0_17 = arith.constant 0 : index
    %c0_18 = arith.constant 0 : index
    %33 = vector.load %arg3[%c0_16, %c0_17, %c0_18] : memref<4x32x32xf32, #tpu.memory_space<vmem>>, vector<1x32x32xf32>
    %34 = vector.shape_cast %33 : vector<1x32x32xf32> to vector<32x32xf32>
    %cst_19 = arith.constant dense<0.000000e+00> : vector<8x32xf32>
    %35 = tpu.matmul %32, %34, %cst_19 {dimension_numbers = #tpu.dot_dimension_numbers<[1], [0], [0], [1], [0, 0, 1, 1], [], []>} : vector<8x32xf32>, vector<32x32xf32>, vector<8x32xf32> -> vector<8x32xf32>
    %36 = vector.broadcast %6 : vector<1x32xf32> to vector<8x32xf32>
    %37 = arith.addf %35, %36 : vector<8x32xf32>
    %c1_20 = arith.constant 1 : index
    %c0_21 = arith.constant 0 : index
    %c0_22 = arith.constant 0 : index
    %38 = vector.load %arg3[%c1_20, %c0_21, %c0_22] : memref<4x32x32xf32, #tpu.memory_space<vmem>>, vector<1x32x32xf32>
    %39 = vector.shape_cast %38 : vector<1x32x32xf32> to vector<32x32xf32>
    %cst_23 = arith.constant dense<0.000000e+00> : vector<8x32xf32>
    %40 = tpu.matmul %32, %39, %cst_23 {dimension_numbers = #tpu.dot_dimension_numbers<[1], [0], [0], [1], [0, 0, 1, 1], [], []>} : vector<8x32xf32>, vector<32x32xf32>, vector<8x32xf32> -> vector<8x32xf32>
    %41 = vector.broadcast %7 : vector<1x32xf32> to vector<8x32xf32>
    %42 = arith.addf %40, %41 : vector<8x32xf32>
    %c2_24 = arith.constant 2 : index
    %c0_25 = arith.constant 0 : index
    %c0_26 = arith.constant 0 : index
    %43 = vector.load %arg3[%c2_24, %c0_25, %c0_26] : memref<4x32x32xf32, #tpu.memory_space<vmem>>, vector<1x32x32xf32>
    %44 = vector.shape_cast %43 : vector<1x32x32xf32> to vector<32x32xf32>
    %cst_27 = arith.constant dense<0.000000e+00> : vector<8x32xf32>
    %45 = tpu.matmul %32, %44, %cst_27 {dimension_numbers = #tpu.dot_dimension_numbers<[1], [0], [0], [1], [0, 0, 1, 1], [], []>} : vector<8x32xf32>, vector<32x32xf32>, vector<8x32xf32> -> vector<8x32xf32>
    %46 = vector.broadcast %8 : vector<1x32xf32> to vector<8x32xf32>
    %47 = arith.addf %45, %46 : vector<8x32xf32>
    %48 = tpu.iota {dimensions = array<i32: 0>} : vector<8x8xi32>
    %49 = tpu.iota {dimensions = array<i32: 1>} : vector<8x8xi32>
    %50 = arith.cmpi sge, %48, %49 : vector<8x8xi32>
    %cst_28 = arith.constant 0.000000e+00 : f32
    %cst_29 = arith.constant -1.000000e+30 : f32
    %51 = vector.broadcast %cst_28 : f32 to vector<8x8xf32>
    %52 = vector.broadcast %cst_29 : f32 to vector<8x8xf32>
    %53 = arith.select %50, %51, %52 : vector<8x8xi1>, vector<8x8xf32>
    %54 = tpu.transpose %42, [1, 0] : vector<8x32xf32> -> vector<32x8xf32>
    %55 = vector.extract_strided_slice %37 {offsets = [0, 0], sizes = [8, 8], strides = [1, 1]} : vector<8x32xf32> to vector<8x8xf32>
    %56 = vector.extract_strided_slice %54 {offsets = [0, 0], sizes = [8, 8], strides = [1, 1]} : vector<32x8xf32> to vector<8x8xf32>
    %57 = vector.extract_strided_slice %47 {offsets = [0, 0], sizes = [8, 8], strides = [1, 1]} : vector<8x32xf32> to vector<8x8xf32>
    %cst_30 = arith.constant dense<0.000000e+00> : vector<8x8xf32>
    %58 = tpu.matmul %55, %56, %cst_30 {dimension_numbers = #tpu.dot_dimension_numbers<[1], [0], [0], [1], [0, 0, 1, 1], [], []>} : vector<8x8xf32>, vector<8x8xf32>, vector<8x8xf32> -> vector<8x8xf32>
    %cst_31 = arith.constant 0.353553385 : f32
    %59 = vector.broadcast %cst_31 : f32 to vector<8x8xf32>
    %60 = arith.mulf %58, %59 : vector<8x8xf32>
    %61 = arith.addf %60, %53 : vector<8x8xf32>
    %cst_32 = arith.constant dense<0xFF800000> : vector<8xf32>
    %62 = vector.multi_reduction <maximumf>, %61, %cst_32 [1] : vector<8x8xf32> to vector<8xf32>
    %63 = vector.shape_cast %62 : vector<8xf32> to vector<8x1xf32>
    %64 = vector.broadcast %63 : vector<8x1xf32> to vector<8x8xf32>
    %65 = arith.subf %61, %64 : vector<8x8xf32>
    %66 = math.exp %65 : vector<8x8xf32>
    %cst_33 = arith.constant dense<0.000000e+00> : vector<8xf32>
    %67 = vector.multi_reduction <add>, %66, %cst_33 [1] : vector<8x8xf32> to vector<8xf32>
    %68 = vector.shape_cast %67 : vector<8xf32> to vector<8x1xf32>
    %69 = vector.broadcast %68 : vector<8x1xf32> to vector<8x8xf32>
    %70 = arith.divf %66, %69 : vector<8x8xf32>
    %cst_34 = arith.constant dense<0.000000e+00> : vector<8x8xf32>
    %71 = tpu.matmul %70, %57, %cst_34 {dimension_numbers = #tpu.dot_dimension_numbers<[1], [0], [0], [1], [0, 0, 1, 1], [], []>} : vector<8x8xf32>, vector<8x8xf32>, vector<8x8xf32> -> vector<8x8xf32>
    %72 = vector.extract_strided_slice %37 {offsets = [0, 8], sizes = [8, 8], strides = [1, 1]} : vector<8x32xf32> to vector<8x8xf32>
    %73 = vector.extract_strided_slice %54 {offsets = [8, 0], sizes = [8, 8], strides = [1, 1]} : vector<32x8xf32> to vector<8x8xf32>
    %74 = vector.extract_strided_slice %47 {offsets = [0, 8], sizes = [8, 8], strides = [1, 1]} : vector<8x32xf32> to vector<8x8xf32>
    %cst_35 = arith.constant dense<0.000000e+00> : vector<8x8xf32>
    %75 = tpu.matmul %72, %73, %cst_35 {dimension_numbers = #tpu.dot_dimension_numbers<[1], [0], [0], [1], [0, 0, 1, 1], [], []>} : vector<8x8xf32>, vector<8x8xf32>, vector<8x8xf32> -> vector<8x8xf32>
    %cst_36 = arith.constant 0.353553385 : f32
    %76 = vector.broadcast %cst_36 : f32 to vector<8x8xf32>
    %77 = arith.mulf %75, %76 : vector<8x8xf32>
    %78 = arith.addf %77, %53 : vector<8x8xf32>
    %cst_37 = arith.constant dense<0xFF800000> : vector<8xf32>
    %79 = vector.multi_reduction <maximumf>, %78, %cst_37 [1] : vector<8x8xf32> to vector<8xf32>
    %80 = vector.shape_cast %79 : vector<8xf32> to vector<8x1xf32>
    %81 = vector.broadcast %80 : vector<8x1xf32> to vector<8x8xf32>
    %82 = arith.subf %78, %81 : vector<8x8xf32>
    %83 = math.exp %82 : vector<8x8xf32>
    %cst_38 = arith.constant dense<0.000000e+00> : vector<8xf32>
    %84 = vector.multi_reduction <add>, %83, %cst_38 [1] : vector<8x8xf32> to vector<8xf32>
    %85 = vector.shape_cast %84 : vector<8xf32> to vector<8x1xf32>
    %86 = vector.broadcast %85 : vector<8x1xf32> to vector<8x8xf32>
    %87 = arith.divf %83, %86 : vector<8x8xf32>
    %cst_39 = arith.constant dense<0.000000e+00> : vector<8x8xf32>
    %88 = tpu.matmul %87, %74, %cst_39 {dimension_numbers = #tpu.dot_dimension_numbers<[1], [0], [0], [1], [0, 0, 1, 1], [], []>} : vector<8x8xf32>, vector<8x8xf32>, vector<8x8xf32> -> vector<8x8xf32>
    %89 = vector.extract_strided_slice %37 {offsets = [0, 16], sizes = [8, 8], strides = [1, 1]} : vector<8x32xf32> to vector<8x8xf32>
    %90 = vector.extract_strided_slice %54 {offsets = [16, 0], sizes = [8, 8], strides = [1, 1]} : vector<32x8xf32> to vector<8x8xf32>
    %91 = vector.extract_strided_slice %47 {offsets = [0, 16], sizes = [8, 8], strides = [1, 1]} : vector<8x32xf32> to vector<8x8xf32>
    %cst_40 = arith.constant dense<0.000000e+00> : vector<8x8xf32>
    %92 = tpu.matmul %89, %90, %cst_40 {dimension_numbers = #tpu.dot_dimension_numbers<[1], [0], [0], [1], [0, 0, 1, 1], [], []>} : vector<8x8xf32>, vector<8x8xf32>, vector<8x8xf32> -> vector<8x8xf32>
    %cst_41 = arith.constant 0.353553385 : f32
    %93 = vector.broadcast %cst_41 : f32 to vector<8x8xf32>
    %94 = arith.mulf %92, %93 : vector<8x8xf32>
    %95 = arith.addf %94, %53 : vector<8x8xf32>
    %cst_42 = arith.constant dense<0xFF800000> : vector<8xf32>
    %96 = vector.multi_reduction <maximumf>, %95, %cst_42 [1] : vector<8x8xf32> to vector<8xf32>
    %97 = vector.shape_cast %96 : vector<8xf32> to vector<8x1xf32>
    %98 = vector.broadcast %97 : vector<8x1xf32> to vector<8x8xf32>
    %99 = arith.subf %95, %98 : vector<8x8xf32>
    %100 = math.exp %99 : vector<8x8xf32>
    %cst_43 = arith.constant dense<0.000000e+00> : vector<8xf32>
    %101 = vector.multi_reduction <add>, %100, %cst_43 [1] : vector<8x8xf32> to vector<8xf32>
    %102 = vector.shape_cast %101 : vector<8xf32> to vector<8x1xf32>
    %103 = vector.broadcast %102 : vector<8x1xf32> to vector<8x8xf32>
    %104 = arith.divf %100, %103 : vector<8x8xf32>
    %cst_44 = arith.constant dense<0.000000e+00> : vector<8x8xf32>
    %105 = tpu.matmul %104, %91, %cst_44 {dimension_numbers = #tpu.dot_dimension_numbers<[1], [0], [0], [1], [0, 0, 1, 1], [], []>} : vector<8x8xf32>, vector<8x8xf32>, vector<8x8xf32> -> vector<8x8xf32>
    %106 = vector.extract_strided_slice %37 {offsets = [0, 24], sizes = [8, 8], strides = [1, 1]} : vector<8x32xf32> to vector<8x8xf32>
    %107 = vector.extract_strided_slice %54 {offsets = [24, 0], sizes = [8, 8], strides = [1, 1]} : vector<32x8xf32> to vector<8x8xf32>
    %108 = vector.extract_strided_slice %47 {offsets = [0, 24], sizes = [8, 8], strides = [1, 1]} : vector<8x32xf32> to vector<8x8xf32>
    %cst_45 = arith.constant dense<0.000000e+00> : vector<8x8xf32>
    %109 = tpu.matmul %106, %107, %cst_45 {dimension_numbers = #tpu.dot_dimension_numbers<[1], [0], [0], [1], [0, 0, 1, 1], [], []>} : vector<8x8xf32>, vector<8x8xf32>, vector<8x8xf32> -> vector<8x8xf32>
    %cst_46 = arith.constant 0.353553385 : f32
    %110 = vector.broadcast %cst_46 : f32 to vector<8x8xf32>
    %111 = arith.mulf %109, %110 : vector<8x8xf32>
    %112 = arith.addf %111, %53 : vector<8x8xf32>
    %cst_47 = arith.constant dense<0xFF800000> : vector<8xf32>
    %113 = vector.multi_reduction <maximumf>, %112, %cst_47 [1] : vector<8x8xf32> to vector<8xf32>
    %114 = vector.shape_cast %113 : vector<8xf32> to vector<8x1xf32>
    %115 = vector.broadcast %114 : vector<8x1xf32> to vector<8x8xf32>
    %116 = arith.subf %112, %115 : vector<8x8xf32>
    %117 = math.exp %116 : vector<8x8xf32>
    %cst_48 = arith.constant dense<0.000000e+00> : vector<8xf32>
    %118 = vector.multi_reduction <add>, %117, %cst_48 [1] : vector<8x8xf32> to vector<8xf32>
    %119 = vector.shape_cast %118 : vector<8xf32> to vector<8x1xf32>
    %120 = vector.broadcast %119 : vector<8x1xf32> to vector<8x8xf32>
    %121 = arith.divf %117, %120 : vector<8x8xf32>
    %cst_49 = arith.constant dense<0.000000e+00> : vector<8x8xf32>
    %122 = tpu.matmul %121, %108, %cst_49 {dimension_numbers = #tpu.dot_dimension_numbers<[1], [0], [0], [1], [0, 0, 1, 1], [], []>} : vector<8x8xf32>, vector<8x8xf32>, vector<8x8xf32> -> vector<8x8xf32>
    %123 = tpu.concatenate %60, %77, %94, %111 in 1 : vector<8x8xf32>, vector<8x8xf32>, vector<8x8xf32>, vector<8x8xf32> -> vector<8x32xf32>
    %124 = tpu.concatenate %71, %88, %105, %122 in 1 : vector<8x8xf32>, vector<8x8xf32>, vector<8x8xf32>, vector<8x8xf32> -> vector<8x32xf32>
    %c3_50 = arith.constant 3 : index
    %c0_51 = arith.constant 0 : index
    %c0_52 = arith.constant 0 : index
    %125 = vector.load %arg3[%c3_50, %c0_51, %c0_52] : memref<4x32x32xf32, #tpu.memory_space<vmem>>, vector<1x32x32xf32>
    %126 = vector.shape_cast %125 : vector<1x32x32xf32> to vector<32x32xf32>
    %cst_53 = arith.constant dense<0.000000e+00> : vector<8x32xf32>
    %127 = tpu.matmul %124, %126, %cst_53 {dimension_numbers = #tpu.dot_dimension_numbers<[1], [0], [0], [1], [0, 0, 1, 1], [], []>} : vector<8x32xf32>, vector<32x32xf32>, vector<8x32xf32> -> vector<8x32xf32>
    %128 = vector.broadcast %9 : vector<1x32xf32> to vector<8x32xf32>
    %129 = arith.addf %127, %128 : vector<8x32xf32>
    %130 = arith.addf %1, %129 : vector<8x32xf32>
    %cst_54 = arith.constant dense<0.000000e+00> : vector<8xf32>
    %131 = vector.multi_reduction <add>, %130, %cst_54 [1] : vector<8x32xf32> to vector<8xf32>
    %132 = vector.shape_cast %131 : vector<8xf32> to vector<8x1xf32>
    %cst_55 = arith.constant 3.200000e+01 : f32
    %133 = vector.broadcast %cst_55 : f32 to vector<8x1xf32>
    %134 = arith.divf %132, %133 : vector<8x1xf32>
    %135 = vector.broadcast %134 : vector<8x1xf32> to vector<8x32xf32>
    %136 = arith.subf %130, %135 : vector<8x32xf32>
    %137 = arith.mulf %136, %136 : vector<8x32xf32>
    %cst_56 = arith.constant dense<0.000000e+00> : vector<8xf32>
    %138 = vector.multi_reduction <add>, %137, %cst_56 [1] : vector<8x32xf32> to vector<8xf32>
    %139 = vector.shape_cast %138 : vector<8xf32> to vector<8x1xf32>
    %cst_57 = arith.constant 3.200000e+01 : f32
    %140 = vector.broadcast %cst_57 : f32 to vector<8x1xf32>
    %141 = arith.divf %139, %140 : vector<8x1xf32>
    %142 = vector.broadcast %134 : vector<8x1xf32> to vector<8x32xf32>
    %143 = arith.subf %130, %142 : vector<8x32xf32>
    %cst_58 = arith.constant 9.99999974E-6 : f32
    %144 = vector.broadcast %cst_58 : f32 to vector<8x1xf32>
    %145 = arith.addf %141, %144 : vector<8x1xf32>
    %146 = math.rsqrt %145 : vector<8x1xf32>
    %147 = vector.broadcast %146 : vector<8x1xf32> to vector<8x32xf32>
    %148 = arith.mulf %143, %147 : vector<8x32xf32>
    %149 = vector.broadcast %4 : vector<1x32xf32> to vector<8x32xf32>
    %150 = arith.mulf %148, %149 : vector<8x32xf32>
    %151 = vector.broadcast %5 : vector<1x32xf32> to vector<8x32xf32>
    %152 = arith.addf %150, %151 : vector<8x32xf32>
    %c0_59 = arith.constant 0 : index
    %c0_60 = arith.constant 0 : index
    %153 = vector.load %arg4[%c0_59, %c0_60] : memref<32x128xf32, #tpu.memory_space<vmem>>, vector<32x128xf32>
    %cst_61 = arith.constant dense<0.000000e+00> : vector<8x128xf32>
    %154 = tpu.matmul %152, %153, %cst_61 {dimension_numbers = #tpu.dot_dimension_numbers<[1], [0], [0], [1], [0, 0, 1, 1], [], []>} : vector<8x32xf32>, vector<32x128xf32>, vector<8x128xf32> -> vector<8x128xf32>
    %c0_62 = arith.constant 0 : index
    %c0_63 = arith.constant 0 : index
    %155 = vector.load %arg5[%c0_62, %c0_63] : memref<1x128xf32, #tpu.memory_space<vmem>>, vector<1x128xf32>
    %156 = vector.broadcast %155 : vector<1x128xf32> to vector<8x128xf32>
    %157 = arith.addf %154, %156 : vector<8x128xf32>
    %cst_64 = arith.constant 5.000000e-01 : f32
    %158 = vector.broadcast %cst_64 : f32 to vector<8x128xf32>
    %159 = arith.mulf %158, %157 : vector<8x128xf32>
    %cst_65 = arith.constant 4.471500e-02 : f32
    %160 = vector.broadcast %cst_65 : f32 to vector<8x128xf32>
    %161 = arith.mulf %160, %157 : vector<8x128xf32>
    %162 = arith.mulf %161, %157 : vector<8x128xf32>
    %163 = arith.mulf %162, %157 : vector<8x128xf32>
    %164 = arith.addf %157, %163 : vector<8x128xf32>
    %cst_66 = arith.constant 0.797884583 : f32
    %165 = vector.broadcast %cst_66 : f32 to vector<8x128xf32>
    %166 = arith.mulf %165, %164 : vector<8x128xf32>
    %167 = math.tanh %166 : vector<8x128xf32>
    %cst_67 = arith.constant 1.000000e+00 : f32
    %168 = vector.broadcast %cst_67 : f32 to vector<8x128xf32>
    %169 = arith.addf %168, %167 : vector<8x128xf32>
    %170 = arith.mulf %159, %169 : vector<8x128xf32>
    %c0_68 = arith.constant 0 : index
    %c0_69 = arith.constant 0 : index
    %171 = vector.load %arg6[%c0_68, %c0_69] : memref<128x32xf32, #tpu.memory_space<vmem>>, vector<128x32xf32>
    %cst_70 = arith.constant dense<0.000000e+00> : vector<8x32xf32>
    %172 = tpu.matmul %170, %171, %cst_70 {dimension_numbers = #tpu.dot_dimension_numbers<[1], [0], [0], [1], [0, 0, 1, 1], [], []>} : vector<8x128xf32>, vector<128x32xf32>, vector<8x32xf32> -> vector<8x32xf32>
    %173 = vector.broadcast %10 : vector<1x32xf32> to vector<8x32xf32>
    %174 = arith.addf %172, %173 : vector<8x32xf32>
    %175 = arith.addf %130, %174 : vector<8x32xf32>
    %c0_71 = arith.constant 0 : index
    %c0_72 = arith.constant 0 : index
    %c0_73 = arith.constant 0 : index
    %176 = vector.load %arg7[%c0_71, %c0_72, %c0_73] : memref<1x8x32xf32, #tpu.memory_space<vmem>>, vector<1x8x32xf32>
    %177 = vector.shape_cast %176 : vector<1x8x32xf32> to vector<8x32xf32>
    %178 = vector.shape_cast %175 : vector<8x32xf32> to vector<1x8x32xf32>
    tpu.vector_store %arg7[%c0_71, %c0_72, %c0_73], %178 {strides = array<i32>} : memref<1x8x32xf32, #tpu.memory_space<vmem>>, vector<1x8x32xf32>,
    %c0_74 = arith.constant 0 : index
    %c0_75 = arith.constant 0 : index
    %c0_76 = arith.constant 0 : index
    %179 = vector.load %arg8[%c0_74, %c0_75, %c0_76] : memref<1x8x32xf32, #tpu.memory_space<vmem>>, vector<1x8x32xf32>
    %180 = vector.shape_cast %179 : vector<1x8x32xf32> to vector<8x32xf32>
    %181 = vector.shape_cast %123 : vector<8x32xf32> to vector<1x8x32xf32>
    tpu.vector_store %arg8[%c0_74, %c0_75, %c0_76], %181 {strides = array<i32>} : memref<1x8x32xf32, #tpu.memory_space<vmem>>, vector<1x8x32xf32>,
    return
  }
  func.func @transform_0(%arg0: i32) -> (i32, i32, i32) {
    %c0_i32 = arith.constant 0 : i32
    %c0_i32_0 = arith.constant 0 : i32
    %c0_i32_1 = arith.constant 0 : i32
    return %arg0, %c0_i32, %c0_i32_0 : i32, i32, i32
  }
  func.func @transform_1(%arg0: i32) -> (i32, i32) {
    %c0_i32 = arith.constant 0 : i32
    %c0_i32_0 = arith.constant 0 : i32
    %c0_i32_1 = arith.constant 0 : i32
    return %c0_i32, %c0_i32_0 : i32, i32
  }
  func.func @transform_2(%arg0: i32) -> (i32, i32, i32) {
    %c0_i32 = arith.constant 0 : i32
    %c0_i32_0 = arith.constant 0 : i32
    %c0_i32_1 = arith.constant 0 : i32
    %c0_i32_2 = arith.constant 0 : i32
    return %c0_i32, %c0_i32_0, %c0_i32_1 : i32, i32, i32
  }
  func.func @transform_3(%arg0: i32) -> (i32, i32) {
    %c0_i32 = arith.constant 0 : i32
    %c0_i32_0 = arith.constant 0 : i32
    %c0_i32_1 = arith.constant 0 : i32
    return %c0_i32, %c0_i32_0 : i32, i32
  }
  func.func @transform_4(%arg0: i32) -> (i32, i32) {
    %c0_i32 = arith.constant 0 : i32
    %c0_i32_0 = arith.constant 0 : i32
    %c0_i32_1 = arith.constant 0 : i32
    return %c0_i32, %c0_i32_0 : i32, i32
  }
  func.func @transform_5(%arg0: i32) -> (i32, i32) {
    %c0_i32 = arith.constant 0 : i32
    %c0_i32_0 = arith.constant 0 : i32
    %c0_i32_1 = arith.constant 0 : i32
    return %c0_i32, %c0_i32_0 : i32, i32
  }
  func.func @transform_6(%arg0: i32) -> (i32, i32, i32) {
    %c0_i32 = arith.constant 0 : i32
    %c0_i32_0 = arith.constant 0 : i32
    %c0_i32_1 = arith.constant 0 : i32
    return %arg0, %c0_i32, %c0_i32_0 : i32, i32, i32
  }
  func.func @transform_7(%arg0: i32) -> (i32, i32, i32) {
    %c0_i32 = arith.constant 0 : i32
    %c0_i32_0 = arith.constant 0 : i32
    %c0_i32_1 = arith.constant 0 : i32
    return %arg0, %c0_i32, %c0_i32_0 : i32, i32, i32
  }
}

</mosaic_0001>

<bundles_post_ra>
// kernel: tpu_custom_call.1
= control target key start
LH: loop header
LB: loop body
LE: loop exit
PB: predicated region body
PF: predicated region fallthrough
CT: control target
= control target key end

     0   :  { %s2727_s0 = inlined_call_operand.hbm [shape: f32[2,8,32], index: 0, kind: input, shape index: {}]   ;;  %s2728_s1 = inlined_call_operand.hbm [shape: f32[9,32], index: 1, kind: input, shape index: {}]   ;;  %s2729_s2 = inlined_call_operand.vmem [shape: f32[4,32,32], index: 2, kind: input, shape index: {}]   ;;  %s2730_s3 = inlined_call_operand.vmem [shape: f32[32,128], index: 3, kind: input, shape index: {}]   ;;  %s2731_s4 = inlined_call_operand.vmem [shape: f32[1,128], index: 4, kind: input, shape index: {}]   ;;  %s2732_s5 = inlined_call_operand.vmem [shape: f32[128,32], index: 5, kind: input, shape index: {}]   ;;  %s2733_s6 = inlined_call_operand.hbm [shape: f32[2,8,32], index: 6, kind: output, shape index: {0}]   ;;  %s2734_s7 = inlined_call_operand.hbm [shape: f32[2,8,32], index: 7, kind: output, shape index: {1}]  }
   0x1   :  { %2739 = sst [smem:[#allocation15_spill]] %s2728_s1 }
   0x2   :  { %13 = vsyncpa [#allocation3], 0 }
   0x3   :  { %15 = vsyncpa [#allocation3 + $0x1], 0 }
   0x4   :  { %16 = vsyncpa [#allocation6], 0 }
   0x5   :  { %17 = vsyncpa [#allocation4], 0 }
   0x6   :  { %19 = vsyncpa [#allocation4 + $0x1], 0 }
   0x7   :  { %20 = vsyncpa [#allocation9], 0 }
   0x8   :  { %22 = vsyncpa [#allocation9 + $0x1], 0  ;;  %s2281_s24 = smov 0   ;;  %s2283_s25 = smov 0  }
   0x9   :  { %s2285_s26 = smov 0   ;;  %s2287_s27 = smov 0  }
   0xa LB: > { %s2302_s28 = sadd.s32 4294967295, %s2224_s27   ;;  %s1733_s29 = sadd.s32 4294967294, %s2224_s27   ;;  %s2224_s27 = sphi %s2287_s27, %s2760_s27   ;;  %s2220_s26 = sphi %s2285_s26, %s2759_s26   ;;  %s2216_s25 = sphi %s2283_s25, %s2758_s25   ;;  %s2212_s24 = sphi %s2281_s24, %s2757_s24  }
   0xb   : > { %p48_p0 = scmp.ne.s32.totalorder %s2216_s25, %s2212_s24  ;;  %p2735_p1 = scmp.eq.s32.totalorder %s2302_s28, 0 }
   0xc   : > { %p183_p3 = scmp.eq.s32.totalorder %s1733_s29, 1  ;;  %p1734_p5 = scmp.ge.s32.totalorder %s2224_s27, 1 }
   0xd   : > { %p2311_p4 = por %p2735_p1, %p48_p0  ;;  %p216_p7 = scmp.lt.s32.totalorder %s2224_s27, 3 }
   0xe   : > { %p2316_p6 = por %p183_p3, %p48_p0  ;;  %s2226_s10 = smov [#allocation5]  }
   0xf   : > { %s2740_s30 = scalar_select %p2311_p4, 1, 0 }
  0x10   : > { %s2741_s8 = scalar_select %p2316_p6, 1, 0 }
  0x11   : > { %p2321_p8 = pnand %p1734_p5, %p216_p7  ;;  %s228_s11 = sshll.u32 %s2226_s10, 4  ;;  %s229_s11 = int_to_ptr.vmem [resolvable:$true] %s228_s11 }
  0x12   : > { %s2335_s13 = sadd.s32 1, %s2224_s27   ;;  %s35_s14 = sadd.s32 1, %s2220_s26 }
  0x13   : > { %s2742_s9 = scalar_select %p2321_p8, 1, 0 }
  0x14   : > { %p1987_p9 = pneg %p2321_p8  ;;  %s32_s15 = ssub.s32 %s2224_s27, %s2335_s13 }
  0x15   : > { %s2083_s16 = scalar_lea.vmem %s229_s11, 256  ;;  %p2091_p5 = scmp.lt.s32.totalorder %s229_s11, %s229_s11 }
  0x16   : > { %p2330_p11 = pnand %p1987_p9, %p2735_p1  ;;  %p2084_p13 = scmp.ne.s32.totalorder %s229_s11, %s2083_s16 }
  0x17   : > { %p2092_p7 = scmp.lt.s32.totalorder %s2083_s16, %s2083_s16 }
  0x18   : > { %p2074_p12 = pneg %p2330_p11 }
  0x19   : > { %p2093_p10 = por %p2092_p7, %p2091_p5 }
  0x1a   : > { %p2086_p0 = pnand %p2084_p13, %p2074_p12 }
  0x1c   : > { %p2087_p3 = pneg %p2086_p0 }
  0x1e   : > { %p2094_p2 = pnand %p2093_p10, %p2087_p3 }
  0x20   : > { %2097 = shalt.err (!%p2094_p2)
}
  0x21   : > { %s2227_s17 = smov 128   ;;  %s2228_s18 = smov 8  }
  0x22   : > { %s2744_s1 = sld [smem:[#allocation15_spill]]  ;;  %p33_p9 = scmp.eq.s32.totalorder %s32_s15, 0 }
  0x23   : > { %p42_p12 = scmp.ne.s32.totalorder %s2220_s26, %s2216_s25  ;;  %p43_p10 = scmp.eq.s32.totalorder %s2224_s27, 0 }
  0x24   : > { %p2003_p2 = scmp.lt.s32.totalorder %s2224_s27, 2  ;;  %p2746_p0 = scmp.eq.s32.totalorder %s2302_s28, 1 }
  0x25   : > { %s2352_s21 = scalar_select %p33_p9, %s2220_s26, %s35_s14  }
  0x26   : > { %p44_p13 = por %p43_p10, %p42_p12  ;;  %p2356_p3 = por %p2746_p0, %p42_p12 }
  0x27   : > { %2745 = sst [smem:[#allocation14_spill]] %s2352_s21  ;;  %s254_s23 = sand.u32 1, %s2220_s26  }
  0x28   : > { %1990 = dma.hbm_to_vmem [thread:$0]  (!%p2330_p11), %s2744_s1, 256, %s229_s11, [#allocation6], %s2227_s17, %s2227_s17, %s2228_s18  }
  0x29   : > { %s2747_s22 = scalar_select %p2356_p3, 1, 0 }
  0x2a   : > { %s1738_s29 = sshll.u32 %s2224_s27, 7  ;;  %s1737_s10 = sshll.u32 %s254_s23, 3 }
  0x2b   : > { %s2365_s19 = scalar_lea.hbm %s2727_s0, %s1738_s29  ;;  %s258_s11 = scalar_lea.vmem [#allocation2], %s1737_s10 }
  0x2c   : > { %s265_s14 = sshll.u32 %s258_s11, 4  ;;  %p2367_p11 = pnand %p2003_p2, %p44_p13  ;;  %s266_s14 = int_to_ptr.vmem [resolvable:$true] %s265_s14 }
  0x2d   : > { %s255_s17 = scalar_lea.sflag [#allocation3], %s254_s23  ;;  %s2098_s18 = scalar_lea.hbm %s2365_s19, 128 }
  0x2e   : > { %p2099_p5 = scmp.ne.s32.totalorder %s2365_s19, %s2098_s18  ;;  %p2100_p7 = pneg %p2367_p11 }
  0x2f   : > { %s2103_s12 = scalar_lea.hbm %s2727_s0, 256  ;;  %p2104_p10 = scmp.lt.s32.totalorder %s2365_s19, %s2727_s0 }
  0x30   : > { %p2101_p9 = pnand %p2100_p7, %p2099_p5  ;;  %p2105_p2 = scmp.lt.s32.totalorder %s2103_s12, %s2098_s18 }
  0x32   : > { %p2102_p12 = pneg %p2101_p9  ;;  %p2106_p13 = por %p2105_p2, %p2104_p10 }
  0x34   : > { %p2107_p0 = pnand %p2106_p13, %p2102_p12 }
  0x36   : > { %2110 = shalt.err (!%p2107_p0)
}
  0x37   : > { %s2111_s11 = scalar_lea.vmem %s266_s14, 128  ;;  %s2229_s23 = smov [#allocation2]  }
  0x38   : > { %p2112_p1 = scmp.ne.s32.totalorder %s266_s14, %s2111_s11  ;;  %s2116_s1 = sshll.u32 %s2229_s23, 4  ;;  %s2117_s1 = int_to_ptr.vmem [resolvable:$false] %s2116_s1 }
  0x39   : > { %s2118_s21 = scalar_lea.vmem %s2117_s1, 256  ;;  %p2119_p5 = scmp.lt.s32.totalorder %s266_s14, %s2117_s1 }
  0x3a   : > { %p2114_p6 = pnand %p2112_p1, %p2100_p7  ;;  %p2120_p9 = scmp.lt.s32.totalorder %s2118_s21, %s2111_s11 }
  0x3c   : > { %p2115_p3 = pneg %p2114_p6  ;;  %p2121_p4 = por %p2120_p9, %p2119_p5 }
  0x3e   : > { %p2122_p8 = pnand %p2121_p4, %p2115_p3 }
  0x40   : > { %2125 = shalt.err (!%p2122_p8)
}
  0x41   : > { %1994 = dma.hbm_to_vmem [thread:$0]  (!%p2367_p11), %s2365_s19, 128, %s266_s14, %s255_s17  }
  0x42   : > { %p2749_p12 = scmp.ne.s32.totalorder %s2742_s9, 0 }
  0x43   : > { %s2388_s18 = sand.u32 (!%p2749_p12), 1, %s2216_s25   ;;  %p2750_p1 = scmp.ne.s32.totalorder (!%p2749_p12), %s2740_s30, 0 }
  0x44   : > { %274 = sbr.rel (%p2749_p12) target bundleno = 2516 (0x9d4), region = 44  ;;  %s2391_s20 = sshll.u32 (!%p2749_p12), %s2388_s18, 3 }
  0x45   : > { %s277_s1 = scalar_lea.sflag (!%p2749_p12), [#allocation3], %s2388_s18  ;;  %s280_s21 = scalar_lea.vmem (!%p2749_p12), [#allocation2], %s2391_s20 }
  0x49   : > { %2195 = dma.done.wait (%p2750_p1), %s277_s1, 128  }
  0x4a   : > { %2197 = vsyncadd (%p2750_p1), %s277_s1, 4294967168  ;;  %p2751_p4 = scmp.eq.s32.totalorder %s2302_s28, 0 }
  0x4c   : > { %2199 = dma.done.wait (%p2751_p4), [#allocation6], 256   ;;  %p2752_p6 = pmov %p2751_p4 }
  0x4d   : > { %vm330_vm0 = vcmask 261120   ;;  %v2403_v0 = vld [vmem:[%s280_s21] sm:$0xff]  ;;  %v358_v7 = vld [vmem:[%s2729_s2 + $0x18] sm:$0xff]  ;;  %v2230_v8 = vmov 0.0   ;;  %v357_v9 = vld [vmem:[%s2729_s2 + $0x10] sm:$0xff]  ;;  %vm2231_vm1 = vmmov 0   ;;  %v594_v47 = vlaneseq }
  0x4e   : > { %2201 = vsyncadd (%p2752_p6), [#allocation6], 4294967040  ;;  %v331_v1 = vsel %vm330_vm0, %v2403_v0, 0.0  ;;  %1847 = vmatprep.subr.mxu1 %v2230_v8  ;;  %1855 = vmatprep.mubr.msk.f32.mxu1 %vm2231_vm1, %v2230_v8  ;;  %v356_v10 = vld [vmem:[%s2729_s2 + $0x8] sm:$0xff]  ;;  %v355_v11 = vld [vmem:[%s2729_s2] sm:$0xff]  ;;  %s2232_s11 = smov 120  }
  0x4f   : > { %332 = vadd.xlane.f32.xlu0 %v331_v1  ;;  %1848 = vmatpush3.msra.mxu1 %v358_v7  ;;  %v1744_v16 = vld [vmem:[#allocation5] ss:$0 sm:$0xff]  ;;  %v1745_v18 = vld [vmem:[#allocation5 + $0x1] ss:$0 sm:$0xff]  ;;  %v1751_v21 = vld [vmem:[%s2729_s2 + $0x38] sm:$0xff]  ;;  %vm600_vm2 = vcmask 64512  }
  0x50   : > { %1890 = vmatprep.subr.mxu0 %v2230_v8  ;;  %1849 = vmatprep.subr.mxu1 %v2230_v8  ;;  %v1750_v22 = vld [vmem:[%s2729_s2 + $0x30] sm:$0xff]  ;;  %v1749_v23 = vld [vmem:[%s2729_s2 + $0x28] sm:$0xff]  ;;  %v1748_v24 = vld [vmem:[%s2729_s2 + $0x20] sm:$0xff]  ;;  %s2233_s23 = smov 112   ;;  %s2234_s1 = smov 104   ;;  %v595_v48 = vshrl.u32 %v594_v47, 7 }
  0x51   : > { %1892 = vmatprep.mubr.msk.f32.mxu0 %vm2231_vm1, %v2230_v8  ;;  %1850 = vmatpush3.msra.mxu1 %v357_v9  ;;  %v1757_v25 = vld [vmem:[%s2729_s2 + $0x58] sm:$0xff]  ;;  %v1756_v26 = vld [vmem:[%s2729_s2 + $0x50] sm:$0xff]  ;;  %v1755_v27 = vld [vmem:[%s2729_s2 + $0x48] sm:$0xff]  ;;  %v597_v49 = vand.u32 127, %v594_v47  ;;  %v2235_v51 = vmov -1e+30  }
  0x52   : > { %1851 = vmatprep.subr.mxu1 %v2230_v8  ;;  %v1754_v28 = vld [vmem:[%s2729_s2 + $0x40] sm:$0xff]  ;;  %v1746_v29 = vld [vmem:[#allocation5 + $0x4] ss:$0 sm:$0xff]  ;;  %v1752_v33 = vld [vmem:[#allocation5 + $0x5] ss:$0 sm:$0xff]  ;;  %s2236_s17 = smov 8  }
  0x53   : > { %1852 = vmatpush3.msra.mxu1 %v356_v10  ;;  %v1758_v37 = vld [vmem:[#allocation5 + $0x6] ss:$0 sm:$0xff]  ;;  %vm598_vm3 = vcmp.ge.s32.totalorder %v595_v48, %v597_v49  ;;  %v1775_v47 = vld [vmem:[%s2729_s2 + $0x78] sm:$0xff]  ;;  %v1773_v49 = vld [vmem:[%s2729_s2 + $0x68] sm:$0xff]  ;;  %s2237_s29 = smov 16   ;;  %s2238_s10 = smov 24  }
  0x54   : > { %1853 = vmatprep.subr.mxu1 %v2230_v8  ;;  %v599_v52 = vsel %vm598_vm3, 0.0, %v2235_v51  ;;  %v1774_v48 = vld [vmem:[%s2729_s2 + $0x70] sm:$0xff]  ;;  %vm1278_vm4 = vcmask 130048   ;;  %vm1280_vm5 = vcmask 195584   ;;  %s319_s15 = scalar_lea.vmem [#allocation8], %s2391_s20  ;;  %s1785_s21 = sshll.u32 %s2302_s28, 7 }
  0x55   : > { %1854 = vmatpush3.msra.mxu1 %v355_v11  ;;  %s1619_s19 = scalar_lea.hbm %s2734_s7, %s1785_s21  ;;  %s1621_s14 = sshll.u32 %s319_s15, 4  ;;  %s1622_s14 = int_to_ptr.vmem [resolvable:$true] %s1621_s14 }
  0x56   : > { %1858 = vmatprep.subr.mxu1 %v2230_v8  ;;  %p2753_p3 = scmp.ne.s32.totalorder %s2747_s22, 0  ;;  %s2239_s12 = smov [#allocation8]  }
  0x57   : > { %s2130_s16 = sshll.u32 %s2239_s12, 4  ;;  %s2131_s16 = int_to_ptr.vmem [resolvable:$false] %s2130_s16 }
  0x58   : > { %p2133_p10 = scmp.lt.s32.totalorder %s1622_s14, %s2131_s16 }
  0xd8   : > { %v333_v2 = vpop.xlane.xlu0 %332 }
  0xd9   : > { %v335_v3 = vmul.f32 0.03125, %v333_v2 }
  0xdb   : > { %v336_v4 = vsub.f32 %v2403_v0, %v335_v3 }
  0xdd   : > { %v337_v5 = vmul.f32 %v336_v4, %v336_v4 }
  0xdf   : > { %v338_v6 = vsel %vm330_vm0, %v337_v5, 0.0 }
  0xe0   : > { %339 = vadd.xlane.f32.xlu0 %v338_v6 }
 0x169   : > { %v340_v12 = vpop.xlane.xlu0 %339 }
 0x16a   : > { %v341_v13 = vmul.f32 0.03125, %v340_v12 }
 0x16c   : > { %v342_v14 = vadd.f32 1e-05, %v341_v13 }
 0x16e   : > { %2050 = vrsqrt.f32 %v342_v14 }
 0x17b   : > { %v2051_v15 = vpop.eup %2050 }
 0x17c   : > { %v344_v17 = vmul.f32 %v2051_v15, %v336_v4 }
 0x17e   : > { %v349_v19 = vmul.f32 %v1744_v16, %v344_v17 }
 0x180   : > { %v354_v20 = vadd.f32 %v1745_v18, %v349_v19 }
 0x182   : > { %1856 = vmatmul.mubr.msk.f32.vlgmr.msra.gmra.mxu1 %vm330_vm0, %v354_v20 }
 0x183   : > { %1859 = vmatpush3.msra.mxu1 %v1751_v21  ;;  %1866 = vmatprep.mubr.msk.f32.mxu1 %vm2231_vm1, %v2230_v8 }
 0x184   : > { %1860 = vmatprep.subr.mxu1 %v2230_v8 }
 0x185   : > { %1861 = vmatpush3.msra.mxu1 %v1750_v22 }
 0x186   : > { %1862 = vmatprep.subr.mxu1 %v2230_v8 }
 0x187   : > { %1863 = vmatpush3.msra.mxu1 %v1749_v23 }
 0x188   : > { %1864 = vmatprep.subr.mxu1 %v2230_v8 }
 0x189   : > { %1865 = vmatpush3.msra.mxu1 %v1748_v24 }
 0x18a   : > { %1867 = vmatmul.mubr.msk.f32.vlgmr.msra.gmra.mxu1 %vm330_vm0, %v354_v20  ;;  %1869 = vmatprep.subr.mxu1 %v2230_v8 }
 0x18b   : > { %1870 = vmatpush3.msra.mxu1 %v1757_v25  ;;  %1877 = vmatprep.mubr.msk.f32.mxu1 %vm2231_vm1, %v2230_v8 }
 0x18c   : > { %1871 = vmatprep.subr.mxu1 %v2230_v8 }
 0x18d   : > { %1872 = vmatpush3.msra.mxu1 %v1756_v26 }
 0x18e   : > { %1873 = vmatprep.subr.mxu1 %v2230_v8 }
 0x18f   : > { %1874 = vmatpush3.msra.mxu1 %v1755_v27 }
 0x190   : > { %1875 = vmatprep.subr.mxu1 %v2230_v8 }
 0x191   : > { %1876 = vmatpush3.msra.mxu1 %v1754_v28 }
 0x192   : > { %1878 = vmatmul.mubr.msk.f32.vlgmr.msra.gmra.mxu1 %vm330_vm0, %v354_v20  ;;  %1880 = vmatprep.subr.mxu1 %v2230_v8 }
 0x193   : > { %1882 = vmatprep.mubr.msk.f32.mxu1 %vm2231_vm1, %v2230_v8 }
 0x242   : > { %v432_v30 = vpop.f32.mrf.mxu1 }
 0x243   : > { %v433_v31 = vadd.f32 %v1746_v29, %v432_v30 }
 0x244   : > { %v1857_v32 = vpop.f32.mrf.mxu1 }
 0x245   : > { %763 = vrot.lane.b32.xlu1 %v433_v31, %s2232_s11 }
 0x24a   : > { %v511_v34 = vpop.f32.mrf.mxu1 }
 0x24b   : > { %v512_v35 = vadd.f32 %v1752_v33, %v511_v34 }
 0x24c   : > { %v1868_v36 = vpop.f32.mrf.mxu1 }
 0x24d   : > { %933 = vrot.lane.b32.xlu0 %v512_v35, %s2233_s23  ;;  %765 = vrot.lane.b32.xlu1 %v512_v35, %s2232_s11 }
 0x24e   : > { %1881 = vmatpush3.xpose.msk.msra.mxu1 %vm600_vm2, %v512_v35 }
 0x24f   : > { %1885 = vmatprep.subr.mxu1 %v2230_v8 }
 0x251   : > { %1883 = vmatmul.mubr.msk.f32.vlgmr.msra.gmra.mxu1 %vm600_vm2, %v433_v31  ;;  %931 = vrot.lane.b32.xlu1 %v433_v31, %s2233_s23 }
 0x252   : > { %v590_v38 = vpop.f32.mrf.mxu1  ;;  %1887 = vmatprep.mubr.msk.f32.mxu1 %vm2231_vm1, %v2230_v8 }
 0x253   : > { %v2481_v39 = vadd.f32 %v1758_v37, %v590_v38 }
 0x254   : > { %v1879_v40 = vpop.f32.mrf.mxu1 }
 0x255   : > { %1100 = vrot.lane.b32.xlu1 %v512_v35, %s2234_s1  ;;  %1886 = vmatpush3.msra.mxu1 %v2481_v39 }
 0x256   : > { %1895 = vmatprep.subr.mxu1 %v2230_v8 }
 0x259   : > { %1098 = vrot.lane.b32.xlu1 %v433_v31, %s2234_s1 }
 0x2b7   : > { %v764_v41 = vpop.permute.xlu1 %763 }
 0x2bf   : > { %v766_v42 = vpop.permute.xlu1 %765  ;;  %v934_v43 = vpop.permute.xlu0 %933 }
 0x2c0   : > { %1891 = vmatpush3.xpose.msk.msra.mxu0 %vm600_vm2, %v766_v42 }
 0x2c1   : > { %1900 = vmatprep.subr.mxu0 %v2230_v8 }
 0x2c3   : > { %1893 = vmatmul.mubr.msk.f32.vlgmr.msra.gmra.mxu0 %vm600_vm2, %v764_v41  ;;  %v932_v44 = vpop.permute.xlu1 %931 }
 0x2c4   : > { %1901 = vmatpush3.xpose.msk.msra.mxu0 %vm600_vm2, %v934_v43  ;;  %1902 = vmatprep.mubr.msk.f32.mxu0 %vm2231_vm1, %v2230_v8 }
 0x2c5   : > { %1910 = vmatprep.subr.mxu0 %v2230_v8 }
 0x2c7   : > { %1903 = vmatmul.mubr.msk.f32.vlgmr.msra.gmra.mxu0 %vm600_vm2, %v932_v44  ;;  %v1101_v45 = vpop.permute.xlu1 %1100 }
 0x2c8   : > { %1911 = vmatpush3.xpose.msk.msra.mxu0 %vm600_vm2, %v1101_v45  ;;  %1912 = vmatprep.mubr.msk.f32.mxu0 %vm2231_vm1, %v2230_v8 }
 0x2c9   : > { %1920 = vmatprep.subr.mxu0 %v2230_v8 }
 0x2cb   : > { %v1099_v46 = vpop.permute.xlu1 %1098 }
 0x2cc   : > { %1913 = vmatmul.mubr.msk.f32.vlgmr.msra.gmra.mxu0 %vm600_vm2, %v1099_v46 }
 0x2cd   : > { %1928 = vmatprep.mubr.msk.f32.mxu0 %vm2231_vm1, %v2230_v8  ;;  %1921 = vmatpush3.msra.mxu0 %v1775_v47 }
 0x2ce   : > { %1922 = vmatprep.subr.mxu0 %v2230_v8 }
 0x2cf   : > { %1923 = vmatpush3.msra.mxu0 %v1774_v48 }
 0x2d0   : > { %1924 = vmatprep.subr.mxu0 %v2230_v8 }
 0x2d1   : > { %1925 = vmatpush3.msra.mxu0 %v1773_v49 }
 0x2d2   : > { %1926 = vmatprep.subr.mxu0 %v2230_v8 }
 0x311   : > { %v673_v50 = vpop.f32.mrf.mxu1 }
 0x312   : > { %v2502_v53 = vmul.f32 0.35355338, %v673_v50 }
 0x313   : > { %v1884_v54 = vpop.f32.mrf.mxu1 }
 0x314   : > { %v678_v55 = vadd.f32 %v2502_v53, %v599_v52 }
 0x316   : > { %v679_v56 = vsel %vm600_vm2, %v678_v55, -inf }
 0x317   : > { %680 = vmax.xlane.f32.xlu1 %v679_v56 }
 0x383   : > { %v837_v57 = vpop.f32.mrf.mxu0 }
 0x384   : > { %v2506_v58 = vmul.f32 0.35355338, %v837_v57 }
 0x385   : > { %v1894_v59 = vpop.f32.mrf.mxu0 }
 0x386   : > { %v842_v60 = vadd.f32 %v2506_v58, %v599_v52 }
 0x387   : > { %v1005_v61 = vpop.f32.mrf.mxu0 }
 0x388   : > { %v2509_v62 = vmul.f32 0.35355338, %v1005_v61  ;;  %v843_v63 = vsel %vm600_vm2, %v842_v60, -inf }
 0x389   : > { %844 = vmax.xlane.f32.xlu0 %v843_v63  ;;  %v1904_v1 = vpop.f32.mrf.mxu0 }
 0x38a   : > { %v1010_v2 = vadd.f32 %v2509_v62, %v599_v52 }
 0x38c   : > { %v1172_v3 = vpop.f32.mrf.mxu0  ;;  %v1011_v4 = vsel %vm600_vm2, %v1010_v2, -inf }
 0x38d   : > { %v2514_v5 = vmul.f32 0.35355338, %v1172_v3  ;;  %1012 = vmax.xlane.f32.xlu1 %v1011_v4  ;;  %v1776_v3 = vld [vmem:[#allocation5 + $0x7] ss:$0 sm:$0xff] }
 0x38e   : > { %v1914_v6 = vpop.f32.mrf.mxu0 }
 0x38f   : > { %v1177_v7 = vadd.f32 %v2514_v5, %v599_v52 }
 0x391   : > { %v1178_v9 = vsel %vm600_vm2, %v1177_v7, -inf }
 0x392   : > { %1179 = vmax.xlane.f32.xlu1 %v1178_v9 }
 0x3a0   : > { %v681_v10 = vpop.xlane.xlu1 %680 }
 0x3a1   : > { %v682_v11 = vsub.f32 %v678_v55, %v681_v10  ;;  %v1772_v55 = vld [vmem:[%s2729_s2 + $0x60] sm:$0xff] }
 0x3a2   : > { %1927 = vmatpush3.msra.mxu0 %v1772_v55 }
 0x3a3   : > { %v683_v12 = vmul.f32 1.442695, %v682_v11  ;;  %1942 = vmatprep.subr.mxu0 %v2230_v8 }
 0x3a5   : > { %2052 = vpow2.f32 %v683_v12 }
 0x3b2   : > { %v2053_v13 = vpop.eup %2052 }
 0x3b3   : > { %v685_v14 = vsel %vm600_vm2, %v2053_v13, 0.0 }
 0x3b4   : > { %686 = vadd.xlane.f32.xlu0 %v685_v14 }
 0x412   : > { %v845_v15 = vpop.xlane.xlu0 %844 }
 0x413   : > { %v846_v16 = vsub.f32 %v842_v60, %v845_v15 }
 0x415   : > { %v847_v17 = vmul.f32 1.442695, %v846_v16 }
 0x416   : > { %v1013_v18 = vpop.xlane.xlu1 %1012 }
 0x417   : > { %2054 = vpow2.f32 %v847_v17  ;;  %v1014_v19 = vsub.f32 %v1010_v2, %v1013_v18 }
 0x419   : > { %v1015_v20 = vmul.f32 1.442695, %v1014_v19 }
 0x41b   : > { %2056 = vpow2.f32 %v1015_v20  ;;  %v1180_v26 = vpop.xlane.xlu1 %1179 }
 0x41c   : > { %v1181_v27 = vsub.f32 %v1177_v7, %v1180_v26  ;;  %v1778_v26 = vld [vmem:[#allocation5 + $0x2] ss:$0 sm:$0xff] }
 0x41e   : > { %v1182_v28 = vmul.f32 1.442695, %v1181_v27 }
 0x424   : > { %v2055_v21 = vpop.eup %2054 }
 0x425   : > { %v849_v22 = vsel %vm600_vm2, %v2055_v21, 0.0 }
 0x426   : > { %850 = vadd.xlane.f32.xlu1 %v849_v22 }
 0x428   : > { %v2057_v23 = vpop.eup %2056 }
 0x429   : > { %v1017_v24 = vsel %vm600_vm2, %v2057_v23, 0.0 }
 0x42a   : > { %1018 = vadd.xlane.f32.xlu0 %v1017_v24 }
 0x437   : > { %1022 = vrot.lane.b32.xlu1 %v2481_v39, %s2233_s23 }
 0x43d   : > { %v687_v25 = vpop.xlane.xlu0 %686 }
 0x43e   : > { %2058 = vrcp.f32 %v687_v25 }
 0x43f   : > { %2060 = vpow2.f32 %v1182_v28  ;;  %v1779_v28 = vld [vmem:[#allocation5 + $0x3] ss:$0 sm:$0xff] }
 0x440   : > { %855 = vrot.lane.b32.xlu0 %v2481_v39, %s2232_s11 }
 0x44b   : > { %v2059_v29 = vpop.eup %2058 }
 0x44c   : > { %v689_v30 = vmul.f32 %v2059_v29, %v2053_v13  ;;  %v2061_v31 = vpop.eup %2060 }
 0x44d   : > { %v1184_v32 = vsel %vm600_vm2, %v2061_v31, 0.0 }
 0x44e   : > { %1888 = vmatmul.mubr.msk.f32.vlgmr.msra.gmra.mxu1 %vm600_vm2, %v689_v30 }
 0x44f   : > { %1897 = vmatprep.mubr.msk.f32.mxu1 %vm2231_vm1, %v2230_v8 }
 0x45b   : > { %1185 = vadd.xlane.f32.xlu1 %v1184_v32  ;;  %v1509_v32 = vld [vmem:[%s2732_s5 + $0x68] sm:$0xff] }
 0x46c   : > { %1189 = vrot.lane.b32.xlu1 %v2481_v39, %s2234_s1 }
 0x4af   : > { %v851_v33 = vpop.xlane.xlu1 %850 }
 0x4b0   : > { %2062 = vrcp.f32 %v851_v33  ;;  %v1508_v33 = vld [vmem:[%s2732_s5 + $0x60] sm:$0xff] }
 0x4b3   : > { %v1019_v34 = vpop.xlane.xlu0 %1018  ;;  %v1023_v38 = vpop.permute.xlu1 %1022 }
 0x4b4   : > { %2064 = vrcp.f32 %v1019_v34  ;;  %v1507_v34 = vld [vmem:[%s2732_s5 + $0x58] sm:$0xff] }
 0x4b7   : > { %v856_v35 = vpop.permute.xlu0 %855 }
 0x4b8   : > { %1896 = vmatpush3.msra.mxu1 %v856_v35  ;;  %v1506_v35 = vld [vmem:[%s2732_s5 + $0x50] sm:$0xff] }
 0x4b9   : > { %1905 = vmatprep.subr.mxu1 %v2230_v8 }
 0x4bd   : > { %v2063_v36 = vpop.eup %2062 }
 0x4be   : > { %v853_v37 = vmul.f32 %v2063_v36, %v2055_v21  ;;  %v1505_v36 = vld [vmem:[%s2732_s5 + $0x48] sm:$0xff] }
 0x4c0   : > { %1898 = vmatmul.mubr.msk.f32.vlgmr.msra.gmra.mxu1 %vm600_vm2, %v853_v37  ;;  %v1504_v37 = vld [vmem:[%s2732_s5 + $0x40] sm:$0xff] }
 0x4c1   : > { %v2065_v40 = vpop.eup %2064  ;;  %1906 = vmatpush3.msra.mxu1 %v1023_v38  ;;  %1907 = vmatprep.mubr.msk.f32.mxu1 %vm2231_vm1, %v2230_v8  ;;  %v1503_v38 = vld [vmem:[%s2732_s5 + $0x38] sm:$0xff] }
 0x4c2   : > { %v1021_v41 = vmul.f32 %v2065_v40, %v2057_v23  ;;  %1915 = vmatprep.subr.mxu1 %v2230_v8  ;;  %v1502_v40 = vld [vmem:[%s2732_s5 + $0x30] sm:$0xff] }
 0x4c4   : > { %1908 = vmatmul.mubr.msk.f32.vlgmr.msra.gmra.mxu1 %vm600_vm2, %v1021_v41  ;;  %v1501_v41 = vld [vmem:[%s2732_s5 + $0x28] sm:$0xff] }
 0x4c5   : > { %1917 = vmatprep.mubr.msk.f32.mxu1 %vm2231_vm1, %v2230_v8 }
 0x4e4   : > { %v1186_v39 = vpop.xlane.xlu1 %1185 }
 0x4e5   : > { %2066 = vrcp.f32 %v1186_v39  ;;  %v1500_v39 = vld [vmem:[%s2732_s5 + $0x20] sm:$0xff] }
 0x4e8   : > { %v1190_v42 = vpop.permute.xlu1 %1189 }
 0x4e9   : > { %1916 = vmatpush3.msra.mxu1 %v1190_v42  ;;  %v1499_v42 = vld [vmem:[%s2732_s5 + $0x18] sm:$0xff] }
 0x4ea   : > { %1931 = vmatprep.subr.mxu1 %v2230_v8 }
 0x4f2   : > { %v2067_v43 = vpop.eup %2066 }
 0x4f3   : > { %v1188_v44 = vmul.f32 %v2067_v43, %v2061_v31  ;;  %v1510_v31 = vld [vmem:[%s2732_s5 + $0x70] sm:$0xff] }
 0x4f4   : > { %v1498_v43 = vld [vmem:[%s2732_s5 + $0x10] sm:$0xff] }
 0x4f5   : > { %1918 = vmatmul.mubr.msk.f32.vlgmr.msra.gmra.mxu1 %vm600_vm2, %v1188_v44  ;;  %v1497_v44 = vld [vmem:[%s2732_s5 + $0x8] sm:$0xff] }
 0x4f6   : > { %1939 = vmatprep.mubr.msk.f32.mxu1 %vm2231_vm1, %v2230_v8 }
 0x50e   : > { %v759_v45 = vpop.f32.mrf.mxu1 }
 0x510   : > { %v1889_v46 = vpop.f32.mrf.mxu1 }
 0x511   : > { %v1780_v46 = vld [vmem:[%s2731_s4] ss:$0 sm:$0xff] }
 0x580   : > { %v927_v50 = vpop.f32.mrf.mxu1 }
 0x581   : > { %1283 = vrot.lane.b32.xlu0 %v927_v50, %s2236_s17 }
 0x582   : > { %v1899_v51 = vpop.f32.mrf.mxu1 }
 0x584   : > { %v1094_v52 = vpop.f32.mrf.mxu1 }
 0x585   : > { %1287 = vrot.lane.b32.xlu1 %v1094_v52, %s2237_s29 }
 0x586   : > { %v1909_v54 = vpop.f32.mrf.mxu1 }
 0x5b5   : > { %v1261_v56 = vpop.f32.mrf.mxu1 }
 0x5b6   : > { %1291 = vrot.lane.b32.xlu0 %v1261_v56, %s2238_s10 }
 0x5b7   : > { %v1919_v57 = vpop.f32.mrf.mxu1 }
 0x5f3   : > { %v1284_v59 = vpop.permute.xlu0 %1283 }
 0x5f4   : > { %v1294_v61 = vsel %vm600_vm2, %v759_v45, %v1284_v59  ;;  %v1496_v45 = vld [vmem:[%s2732_s5] sm:$0xff] }
 0x5f7   : > { %v1288_v60 = vpop.permute.xlu1 %1287 }
 0x5f8   : > { %v1295_v63 = vsel %vm1278_vm4, %v1294_v61, %v1288_v60 }
 0x628   : > { %v1292_v1 = vpop.permute.xlu0 %1291 }
 0x629   : > { %v1296_v2 = vsel %vm1280_vm5, %v1295_v63, %v1292_v1 }
 0x62a   : > { %1929 = vmatmul.mubr.msk.f32.vlgmr.msra.gmra.mxu0 %vm330_vm0, %v1296_v2 }
 0x62b   : > { %1974 = vmatprep.mubr.msk.f32.mxu0 %vm2231_vm1, %v2230_v8 }
 0x6ea   : > { %v1375_v4 = vpop.f32.mrf.mxu0 }
 0x6eb   : > { %v1376_v6 = vadd.f32 %v1776_v3, %v1375_v4 }
 0x6ec   : > { %v1930_v7 = vpop.f32.mrf.mxu0 }
 0x6ed   : > { %v2567_v9 = vadd.f32 %v1376_v6, %v2403_v0  ;;  %v1406_v0 = vld [vmem:[%s2730_s3 + $0x18] sm:$0xff] }
 0x6ee   : > { %1932 = vmatpush3.msra.mxu1 %v1406_v0 }
 0x6ef   : > { %v1380_v10 = vsel %vm330_vm0, %v2567_v9, 0.0  ;;  %1933 = vmatprep.subr.mxu1 %v2230_v8 }
 0x6f0   : > { %1381 = vadd.xlane.f32.xlu1 %v1380_v10 }
 0x701   : > { %1270 = vrot.lane.b32.xlu1 %v2509_v62, %s2237_s29  ;;  %v1405_v62 = vld [vmem:[%s2730_s3 + $0x10] sm:$0xff]  ;;  %s2126_s29 = scalar_lea.vmem %s1622_s14, 128 }
 0x702   : > { %1934 = vmatpush3.msra.mxu1 %v1405_v62  ;;  %p2127_p8 = scmp.ne.s32.totalorder %s1622_s14, %s2126_s29 }
 0x703   : > { %1935 = vmatprep.subr.mxu1 %v2230_v8 }
 0x704   : > { %p2128_p11 = pnand %p2127_p8, %p2753_p3 }
 0x705   : > { %1274 = vrot.lane.b32.xlu1 %v2514_v5, %s2238_s10  ;;  %v1404_v5 = vld [vmem:[%s2730_s3 + $0x8] sm:$0xff]  ;;  %s2132_s10 = scalar_lea.vmem %s2131_s16, 256 }
 0x706   : > { %1936 = vmatpush3.msra.mxu1 %v1404_v5  ;;  %p2129_p7 = pneg %p2128_p11  ;;  %p2134_p2 = scmp.lt.s32.totalorder %s2132_s10, %s2126_s29 }
 0x707   : > { %1937 = vmatprep.subr.mxu1 %v2230_v8 }
 0x708   : > { %p2135_p13 = por %p2134_p2, %p2133_p10 }
 0x70a   : > { %p2136_p0 = pnand %p2135_p13, %p2129_p7 }
 0x779   : > { %v1382_v11 = vpop.xlane.xlu1 %1381 }
 0x77a   : > { %v1383_v12 = vmul.f32 0.03125, %v1382_v11 }
 0x77c   : > { %v1384_v13 = vsub.f32 %v2567_v9, %v1383_v12 }
 0x77d   : > { %v1271_v16 = vpop.permute.xlu1 %1270 }
 0x77e   : > { %v1385_v14 = vmul.f32 %v1384_v13, %v1384_v13 }
 0x780   : > { %v1386_v15 = vsel %vm330_vm0, %v1385_v14, 0.0 }
 0x781   : > { %1387 = vadd.xlane.f32.xlu0 %v1386_v15  ;;  %v1275_v22 = vpop.permute.xlu1 %1274 }
 0x797   : > { %1266 = vrot.lane.b32.xlu0 %v2506_v58, %s2236_s17  ;;  %v1403_v58 = vld [vmem:[%s2730_s3] sm:$0xff]  ;;  %s1595_s17 = scalar_lea.sflag [#allocation9], %s2388_s18 }
 0x798   : > { %1938 = vmatpush3.msra.mxu1 %v1403_v58 }
 0x80a   : > { %v1388_v17 = vpop.xlane.xlu0 %1387 }
 0x80b   : > { %v1389_v18 = vmul.f32 0.03125, %v1388_v17 }
 0x80d   : > { %v1390_v19 = vadd.f32 1e-05, %v1389_v18 }
 0x80e   : > { %v1267_v20 = vpop.permute.xlu0 %1266 }
 0x80f   : > { %2068 = vrsqrt.f32 %v1390_v19  ;;  %v1277_v21 = vsel %vm600_vm2, %v2502_v53, %v1267_v20  ;;  %v1511_v53 = vld [vmem:[%s2732_s5 + $0x78] sm:$0xff] }
 0x810   : > { %v1279_v23 = vsel %vm1278_vm4, %v1277_v21, %v1271_v16  ;;  %1943 = vmatpush3.msra.mxu0 %v1511_v53 }
 0x811   : > { %v1281_v24 = vsel %vm1280_vm5, %v1279_v23, %v1275_v22  ;;  %1944 = vmatprep.subr.mxu0 %v2230_v8 }
 0x812   : > { %1588 = vst.msk [vmem:[%s319_s15] sm:$0xff] %vm330_vm0, %v1281_v24  ;;  %1945 = vmatpush3.msra.mxu0 %v1510_v31 }
 0x813   : > { %1946 = vmatprep.subr.mxu0 %v2230_v8 }
 0x814   : > { %1947 = vmatpush3.msra.mxu0 %v1509_v32 }
 0x815   : > { %1948 = vmatprep.subr.mxu0 %v2230_v8 }
 0x816   : > { %1949 = vmatpush3.msra.mxu0 %v1508_v33 }
 0x817   : > { %1950 = vmatprep.subr.mxu0 %v2230_v8 }
 0x818   : > { %1951 = vmatpush3.msra.mxu0 %v1507_v34 }
 0x819   : > { %1952 = vmatprep.subr.mxu0 %v2230_v8 }
 0x81a   : > { %1953 = vmatpush3.msra.mxu0 %v1506_v35 }
 0x81b   : > { %1954 = vmatprep.subr.mxu0 %v2230_v8 }
 0x81c   : > { %v2069_v25 = vpop.eup %2068  ;;  %1955 = vmatpush3.msra.mxu0 %v1505_v36 }
 0x81d   : > { %v1392_v27 = vmul.f32 %v2069_v25, %v1384_v13  ;;  %1956 = vmatprep.subr.mxu0 %v2230_v8 }
 0x81e   : > { %1957 = vmatpush3.msra.mxu0 %v1504_v37 }
 0x81f   : > { %v1397_v29 = vmul.f32 %v1778_v26, %v1392_v27  ;;  %1958 = vmatprep.subr.mxu0 %v2230_v8 }
 0x820   : > { %1959 = vmatpush3.msra.mxu0 %v1503_v38 }
 0x821   : > { %v1402_v30 = vadd.f32 %v1779_v28, %v1397_v29  ;;  %1960 = vmatprep.subr.mxu0 %v2230_v8 }
 0x822   : > { %1961 = vmatpush3.msra.mxu0 %v1502_v40 }
 0x823   : > { %1940 = vmatmul.mubr.msk.f32.vlgmr.msra.gmra.mxu1 %vm330_vm0, %v1402_v30  ;;  %1962 = vmatprep.subr.mxu0 %v2230_v8 }
 0x824   : > { %1963 = vmatpush3.msra.mxu0 %v1501_v41 }
 0x825   : > { %1964 = vmatprep.subr.mxu0 %v2230_v8 }
 0x826   : > { %1965 = vmatpush3.msra.mxu0 %v1500_v39 }
 0x827   : > { %1966 = vmatprep.subr.mxu0 %v2230_v8 }
 0x828   : > { %1967 = vmatpush3.msra.mxu0 %v1499_v42 }
 0x829   : > { %1968 = vmatprep.subr.mxu0 %v2230_v8 }
 0x82a   : > { %1969 = vmatpush3.msra.mxu0 %v1498_v43 }
 0x82b   : > { %1970 = vmatprep.subr.mxu0 %v2230_v8 }
 0x82c   : > { %1971 = vmatpush3.msra.mxu0 %v1497_v44 }
 0x82d   : > { %1972 = vmatprep.subr.mxu0 %v2230_v8 }
 0x82e   : > { %1973 = vmatpush3.msra.mxu0 %v1496_v45 }
 0x8e3   : > { %v1483_v47 = vpop.f32.mrf.mxu1 }
 0x8e4   : > { %v1484_v48 = vadd.f32 %v1780_v46, %v1483_v47 }
 0x8e5   : > { %v1941_v49 = vpop.f32.mrf.mxu1 }
 0x8e6   : > { %v1488_v50 = vmul.f32 0.044715, %v1484_v48  ;;  %v1487_v56 = vmul.f32 0.5, %v1484_v48 }
 0x8e8   : > { %v1489_v51 = vmul.f32 %v1488_v50, %v1484_v48 }
 0x8ea   : > { %v1490_v52 = vmul.f32 %v1489_v51, %v1484_v48 }
 0x8ec   : > { %v1491_v54 = vadd.f32 %v1490_v52, %v1484_v48 }
 0x8ee   : > { %v1492_v55 = vmul.f32 0.7978846, %v1491_v54 }
 0x8f0   : > { %2070 = vtanh.f32 %v1492_v55 }
 0x8fd   : > { %v2071_v8 = vpop.eup %2070 }
 0x8fe   : > { %v1494_v57 = vadd.f32 1.0, %v2071_v8 }
 0x900   : > { %v1495_v59 = vmul.f32 %v1494_v57, %v1487_v56 }
 0x902   : > { %1975 = vmatmul.mubr.f32.vlgmr.msra.gmra.mxu0 %v1495_v59 }
 0x903   : > { %2139 = shalt.err (!%p2136_p0)
}
 0x904   : > { %s2140_s11 = scalar_lea.hbm %s1619_s19, 128  ;;  %s2144_s1 = scalar_lea.hbm %s2734_s7, 256 }
 0x905   : > { %p2141_p5 = scmp.ne.s32.totalorder %s1619_s19, %s2140_s11  ;;  %p2145_p1 = scmp.lt.s32.totalorder %s1619_s19, %s2734_s7 }
 0x906   : > { %p2146_p4 = scmp.lt.s32.totalorder %s2144_s1, %s2140_s11 }
 0x907   : > { %p2142_p9 = pnand %p2141_p5, %p2753_p3 }
 0x908   : > { %p2147_p6 = por %p2146_p4, %p2145_p1 }
 0x909   : > { %p2143_p12 = pneg %p2142_p9 }
 0x90b   : > { %p2148_p8 = pnand %p2147_p6, %p2143_p12 }
 0x90d   : > { %2151 = shalt.err (!%p2148_p8)
}
 0x90e   : > { %1984 = dma.vmem_to_hbm [thread:$0]  (%p2753_p3), %s1622_s14, 128, %s1619_s19, %s1595_s17   ;;  %v1782_v60 = vld [vmem:[#allocation5 + $0x8] ss:$0 sm:$0xff] }
 0x90f   : > { %s312_s29 = scalar_lea.vmem [#allocation7], %s2391_s20  ;;  %s1606_s11 = scalar_lea.hbm %s2733_s6, %s1785_s21 }
 0x910   : > { %s1608_s12 = sshll.u32 %s312_s29, 4  ;;  %s1590_s15 = scalar_lea.sflag [#allocation4], %s2388_s18  ;;  %s1609_s12 = int_to_ptr.vmem [resolvable:$true] %s1608_s12 }
 0x911   : > { %s2152_s23 = scalar_lea.vmem %s1609_s12, 128  ;;  %s2240_s20 = smov [#allocation7]  }
 0x912   : > { %p2153_p11 = scmp.ne.s32.totalorder %s1609_s12, %s2152_s23  ;;  %s2156_s19 = sshll.u32 %s2240_s20, 4  ;;  %s2157_s19 = int_to_ptr.vmem [resolvable:$false] %s2156_s19 }
 0x913   : > { %s2158_s14 = scalar_lea.vmem %s2157_s19, 256  ;;  %p2159_p2 = scmp.lt.s32.totalorder %s1609_s12, %s2157_s19 }
 0x914   : > { %p2154_p7 = pnand %p2153_p11, %p2753_p3  ;;  %p2160_p13 = scmp.lt.s32.totalorder %s2158_s14, %s2152_s23 }
 0x916   : > { %p2155_p10 = pneg %p2154_p7  ;;  %p2161_p0 = por %p2160_p13, %p2159_p2 }
 0x918   : > { %p2162_p5 = pnand %p2161_p0, %p2155_p10 }
 0x9c2   : > { %v1582_v61 = vpop.f32.mrf.mxu0 }
 0x9c3   : > { %v1583_v63 = vadd.f32 %v1782_v60, %v1582_v61 }
 0x9c4   : > { %v1976_v1 = vpop.f32.mrf.mxu0 }
 0x9c5   : > { %v1586_v2 = vadd.f32 %v1583_v63, %v2567_v9 }
 0x9c7   : > { %1587 = vst.msk [vmem:[%s312_s29] sm:$0xff] %vm330_vm0, %v1586_v2 }
 0x9c8   : > { %2165 = shalt.err (!%p2162_p5)
}
 0x9c9   : > { %s2166_s28 = scalar_lea.hbm %s1606_s11, 128  ;;  %s2170_s17 = scalar_lea.hbm %s2733_s6, 256 }
 0x9ca   : > { %p2167_p9 = scmp.ne.s32.totalorder %s1606_s11, %s2166_s28  ;;  %p2171_p4 = scmp.lt.s32.totalorder %s1606_s11, %s2733_s6 }
 0x9cb   : > { %p2172_p6 = scmp.lt.s32.totalorder %s2170_s17, %s2166_s28 }
 0x9cc   : > { %p2168_p12 = pnand %p2167_p9, %p2753_p3 }
 0x9cd   : > { %p2173_p8 = por %p2172_p6, %p2171_p4 }
 0x9ce   : > { %p2169_p1 = pneg %p2168_p12 }
 0x9d0   : > { %p2174_p11 = pnand %p2173_p8, %p2169_p1 }
 0x9d2   : > { %2177 = shalt.err (!%p2174_p11)
}
 0x9d3   : > { %1983 = dma.vmem_to_hbm [thread:$0]  (%p2753_p3), %s1609_s12, 128, %s1606_s11, %s1590_s15  }
 0x9d4 PF: > { %s1633_s9 = sand.u32 1, %s2212_s24   ;;  %p2754_p7 = scmp.ne.s32.totalorder %s2741_s8, 0 }
 0x9d5   : > { %p2755_p10 = scmp.ge.s32.totalorder %s2224_s27, 2  ;;  %s1634_s29 = scalar_lea.sflag [#allocation4], %s1633_s9 }
 0x9d7   : > { %p1996_p2 = pnand %p2755_p10, %p2754_p7 }
 0x9d9   : > { %p1997_p13 = pneg %p1996_p2 }
 0x9db   : > { %2203 = dma.done.wait (%p1997_p13), %s1634_s29, 128  }
 0x9dc   : > { %2205 = vsyncadd (%p1997_p13), %s1634_s29, 4294967168  ;;  %s1643_s16 = scalar_lea.sflag [#allocation9], %s1633_s9 }
 0x9dd   : > { %2207 = dma.done.wait (%p1997_p13), %s1643_s16, 128  }
 0x9de   : > { %2209 = vsyncadd (%p1997_p13), %s1643_s16, 4294967168  ;;  %s2756_s22 = sld [smem:[#allocation14_spill]]  ;;  %p25_p3 = scmp.ge.s32.totalorder %s2335_s13, 4  }
 0x9df   : > { %s2757_s24 = smov %s2216_s25  ;;  %s2758_s25 = smov %s2220_s26 }
 0x9e0   : > { %s2760_s27 = smov %s2335_s13  ;;  %27 = sbr.rel (!%p25_p3) target bundleno = 10 (0xa), region = 113 }
 0x9e4   : > { %s2759_s26 = smov %s2756_s22 }
 0x9e5   :  { %1648 = vsyncpa [#allocation3], 1 }
 0x9e6   :  { %1650 = vsyncpa [#allocation3 + $0x1], 1 }
 0x9e7   :  { %1651 = vsyncpa [#allocation6], 1 }
 0x9e8   :  { %1652 = vsyncpa [#allocation4], 1 }
 0x9e9   :  { %1654 = vsyncpa [#allocation4 + $0x1], 1 }
 0x9ea   :  { %1655 = vsyncpa [#allocation9], 1 }
 0x9eb   :  { %1657 = vsyncpa [#allocation9 + $0x1], 1 }

</bundles_post_ra>
